<compile_context>
chip_gen: v7x
topology: tpu7x:2x2x1
jax: 0.10.0
libtpu: 0.0.40
codegen_flags: <defaults>
</compile_context>

<pallas_src>
import functools
import math

import jax
import jax.numpy as jnp
from jax.experimental import pallas as pl
from jax.experimental.pallas import tpu as pltpu

TILE_M = 512      # dst-row tile of A_hat (grid axis 0, "parallel")
TILE_K = 512      # src-row tile of A_hat (grid axis 1, "arbitrary" reduction)
LANE = 128


def _round_up(x, m):
    return (x + m - 1) // m * m


# ---------------------------------------------------------------------------
# Kernel 1: row-tiled feature transform  xw = x @ W  (bf16 in / bf16 out)
# ---------------------------------------------------------------------------
def feat_transform_kernel(x_ref, w_ref, o_ref):
    o_ref[...] = jnp.dot(
        x_ref[...], w_ref[...], preferred_element_type=jnp.float32
    ).astype(o_ref.dtype)


def feat_transform(x_bf16, w_bf16, *, tile_m=TILE_M):
    n, f_in = x_bf16.shape
    f_out = w_bf16.shape[1]
    return pl.pallas_call(
        feat_transform_kernel,
        out_shape=jax.ShapeDtypeStruct((n, f_out), jnp.bfloat16),
        grid=(n // tile_m,),
        in_specs=[
            pl.BlockSpec((tile_m, f_in), lambda i: (i, 0)),
            pl.BlockSpec((f_in, f_out), lambda i: (0, 0)),
        ],
        out_specs=pl.BlockSpec((tile_m, f_out), lambda i: (i, 0)),
        compiler_params=pltpu.CompilerParams(
            dimension_semantics=("parallel",)),
        cost_estimate=pl.CostEstimate(
            flops=2 * n * f_in * f_out,
            transcendentals=0,
            bytes_accessed=(n * f_in + f_in * f_out + n * f_out) * 2),
    )(x_bf16, w_bf16)


# ---------------------------------------------------------------------------
# Kernel 2 (layer 1, fused): tiled A_hat @ xw with epilogue
#   emb = l2norm(dropout(relu(acc + b1))) ;  zw = emb @ W2   (bf16)
# ---------------------------------------------------------------------------
def layer1_kernel(a_ref, h_ref, b1_ref, bits_ref, w2_ref,
                  emb_ref, zw_ref, acc_ref,
                  *, keep_threshold, inv_keep, apply_dropout):
    k = pl.program_id(1)

    @pl.when(k == 0)
    def _():
        acc_ref[...] = jnp.zeros_like(acc_ref)

    acc_ref[...] += jnp.dot(a_ref[...], h_ref[...],
                            preferred_element_type=jnp.float32)

    @pl.when(k == pl.num_programs(1) - 1)
    def _():
        h = jnp.maximum(acc_ref[...] + b1_ref[...], 0.0)         # bias + relu
        if apply_dropout:                                        # static branch
            keep = bits_ref[...] >= jnp.uint32(keep_threshold)   # P(keep)=1-p
            h = jnp.where(keep, h * jnp.float32(inv_keep), 0.0)
        # F.normalize(p=2, dim=1): x / max(||x||,1e-12) == x*rsqrt(max(ss,1e-24))
        sumsq = jnp.sum(h * h, axis=1, keepdims=True)
        emb = h * jax.lax.rsqrt(jnp.maximum(sumsq, jnp.float32(1e-24)))
        emb_ref[...] = emb
        # fused layer-2 feature transform (emb @ W2), stored bf16 for kernel 3
        zw_ref[...] = jnp.dot(emb.astype(zw_ref.dtype), w2_ref[...],
                              preferred_element_type=jnp.float32
                              ).astype(zw_ref.dtype)


def aggregate_layer1(a_bf16, xw_bf16, b1, bits, w2_bf16, dropout_p,
                     *, tile_m=TILE_M, tile_k=TILE_K):
    n = a_bf16.shape[0]
    hid = xw_bf16.shape[1]
    out = w2_bf16.shape[1]
    p = float(dropout_p)
    apply_dropout = p > 0.0
    keep_threshold = min(int(p * (2 ** 32)), 2 ** 32 - 1)
    inv_keep = 1.0 / (1.0 - p) if apply_dropout else 1.0
    kernel = functools.partial(
        layer1_kernel, keep_threshold=keep_threshold, inv_keep=inv_keep,
        apply_dropout=apply_dropout)
    return pl.pallas_call(
        kernel,
        out_shape=(jax.ShapeDtypeStruct((n, hid), jnp.float32),
                   jax.ShapeDtypeStruct((n, out), jnp.bfloat16)),
        grid=(n // tile_m, n // tile_k),
        in_specs=[
            pl.BlockSpec((tile_m, tile_k), lambda i, k: (i, k)),
            pl.BlockSpec((tile_k, hid), lambda i, k: (k, 0)),
            pl.BlockSpec((1, hid), lambda i, k: (0, 0)),
            pl.BlockSpec((tile_m, hid), lambda i, k: (i, 0)),
            pl.BlockSpec((hid, out), lambda i, k: (0, 0)),
        ],
        out_specs=(pl.BlockSpec((tile_m, hid), lambda i, k: (i, 0)),
                   pl.BlockSpec((tile_m, out), lambda i, k: (i, 0))),
        scratch_shapes=[pltpu.VMEM((tile_m, hid), jnp.float32)],
        compiler_params=pltpu.CompilerParams(
            dimension_semantics=("parallel", "arbitrary"),
            vmem_limit_bytes=32 * 1024 * 1024),
        cost_estimate=pl.CostEstimate(
            flops=2 * n * n * hid + 2 * n * hid * out + 8 * n * hid,
            transcendentals=n,
            bytes_accessed=(n * n * 2 + (n // tile_m) * n * hid * 2
                            + n * hid * 4 + n * hid * 4 + n * out * 2)),
    )(a_bf16, xw_bf16, b1, bits, w2_bf16)


# ---------------------------------------------------------------------------
# Kernel 3 (layer 2): tiled aggregation  out = A_hat @ zw + b2
# ---------------------------------------------------------------------------
def aggregate_kernel(a_ref, h_ref, b_ref, o_ref, acc_ref):
    k = pl.program_id(1)

    @pl.when(k == 0)
    def _():
        acc_ref[...] = jnp.zeros_like(acc_ref)

    acc_ref[...] += jnp.dot(a_ref[...], h_ref[...],
                            preferred_element_type=jnp.float32)

    @pl.when(k == pl.num_programs(1) - 1)
    def _():
        o_ref[...] = acc_ref[...] + b_ref[...]


def aggregate(a_bf16, zw_bf16, b2, *, tile_m=TILE_M, tile_k=TILE_K):
    n = a_bf16.shape[0]
    f = zw_bf16.shape[1]
    return pl.pallas_call(
        aggregate_kernel,
        out_shape=jax.ShapeDtypeStruct((n, f), jnp.float32),
        grid=(n // tile_m, n // tile_k),
        in_specs=[
            pl.BlockSpec((tile_m, tile_k), lambda i, k: (i, k)),
            pl.BlockSpec((tile_k, f), lambda i, k: (k, 0)),
            pl.BlockSpec((1, f), lambda i, k: (0, 0)),
        ],
        out_specs=pl.BlockSpec((tile_m, f), lambda i, k: (i, 0)),
        scratch_shapes=[pltpu.VMEM((tile_m, f), jnp.float32)],
        compiler_params=pltpu.CompilerParams(
            dimension_semantics=("parallel", "arbitrary"),
            vmem_limit_bytes=32 * 1024 * 1024),
        cost_estimate=pl.CostEstimate(
            flops=2 * n * n * f,
            transcendentals=0,
            bytes_accessed=n * n * 2 + (n // tile_m) * n * f * 2 + n * f * 4),
    )(a_bf16, zw_bf16, b2)


# ---------------------------------------------------------------------------
# Forward wrapper: pad to lane-dense / tile-aligned shapes + 3 pallas_calls
# ---------------------------------------------------------------------------
def gcn_forward(x, a_hat, w1, b1, w2, b2, dropout_key, dropout_p,
                *, tile_m=TILE_M, tile_k=TILE_K):
    n, feat = x.shape
    hid = w1.shape[1]
    out_dim = w2.shape[1]

    n_pad = _round_up(n, math.lcm(tile_m, tile_k))
    feat_pad = _round_up(feat, LANE)
    hid_pad = _round_up(hid, LANE)
    out_pad = _round_up(out_dim, LANE)

    bf = jnp.bfloat16
    # zero-pad to lane-dense / tile-aligned shapes (sliced off at the end)
    x_p = jnp.zeros((n_pad, feat_pad), bf).at[:n, :feat].set(x.astype(bf))
    a_bf16 = jnp.zeros((n_pad, n_pad), bf).at[:n, :n].set(a_hat.astype(bf))
    w1_p = jnp.zeros((feat_pad, hid_pad), bf).at[:feat, :hid].set(w1.astype(bf))
    b1_p = jnp.zeros((1, hid_pad), jnp.float32).at[:, :hid].set(b1)
    w2_p = jnp.zeros((hid_pad, out_pad), bf).at[:hid, :out_dim].set(w2.astype(bf))
    b2_p = jnp.zeros((1, out_pad), jnp.float32).at[:, :out_dim].set(b2)

    # dropout randomness (uint32 bits, integer-threshold compare in-kernel)
    bits = jax.random.bits(dropout_key, (n_pad, hid_pad), jnp.uint32)

    xw = feat_transform(x_p, w1_p, tile_m=tile_m)                      # X @ W1
    emb_p, zw = aggregate_layer1(a_bf16, xw, b1_p, bits, w2_p, dropout_p,
                                 tile_m=tile_m, tile_k=tile_k)         # layer 1
    out_p = aggregate(a_bf16, zw, b2_p, tile_m=tile_m, tile_k=tile_k)  # layer 2

    return emb_p[:n, :hid], out_p[:n, :out_dim]


# ---------------------------------------------------------------------------
# Plain-JAX glue: dense GCN-normalized adjacency (with self loops), [dst, src]
# ---------------------------------------------------------------------------
def normalized_adjacency(edge_index, num_nodes):
    src, dst = edge_index[0], edge_index[1]
    loop = jnp.arange(num_nodes, dtype=src.dtype)
    src = jnp.concatenate([src, loop])
    dst = jnp.concatenate([dst, loop])
    adj = jnp.zeros((num_nodes, num_nodes), jnp.float32).at[dst, src].add(1.0)
    deg = adj.sum(axis=1)
    dinv = jnp.where(deg > 0, 1.0 / jnp.sqrt(deg), 0.0)
    return dinv[:, None] * adj * dinv[None, :]


def glorot(key, shape):
    fan_in, fan_out = shape
    limit = jnp.sqrt(6.0 / (fan_in + fan_out))
    return jax.random.uniform(key, shape, jnp.float32, -limit, limit)


# Pure-JAX reference (dropout off) mirroring the kernel's bf16 quantization.
def gcn_reference(x, a_hat, w1, b1, w2, b2):
    bf, f32 = jnp.bfloat16, jnp.float32
    a = a_hat.astype(bf)
    xw = jnp.dot(x.astype(bf), w1.astype(bf),
                 preferred_element_type=f32).astype(bf)
    h = jnp.dot(a, xw, preferred_element_type=f32) + b1
    h = jnp.maximum(h, 0.0)
    sumsq = jnp.sum(h * h, axis=1, keepdims=True)
    emb = h * jax.lax.rsqrt(jnp.maximum(sumsq, jnp.float32(1e-24)))
    zw = jnp.dot(emb.astype(bf), w2.astype(bf),
                 preferred_element_type=f32).astype(bf)
    out = jnp.dot(a, zw, preferred_element_type=f32) + b2
    return emb, out


if __name__ == "__main__":
    # Small, module-consistent shapes: N nodes, feat_dim -> hid_dim -> out_dim
    N, FEAT, HID, OUT = 16, 8, 32, 4
    DROPOUT = 0.5

    key = jax.random.PRNGKey(0)
    kx, ke, kw1, kw2, kdrop = jax.random.split(key, 5)

    # node features
    x = jax.random.normal(kx, (N, FEAT), jnp.float32)

    # random directed edge list (2, E), symmetrized like typical GCN inputs
    E = 24
    src = jax.random.randint(ke, (E,), 0, N, jnp.int32)
    dst = jax.random.randint(jax.random.fold_in(ke, 1), (E,), 0, N, jnp.int32)
    edge_index = jnp.stack(
        [jnp.concatenate([src, dst]), jnp.concatenate([dst, src])], axis=0)

    # GCNConv parameters (glorot weights, zero bias), deterministic
    w1 = glorot(kw1, (FEAT, HID))
    b1 = jnp.zeros((1, HID), jnp.float32)
    w2 = glorot(kw2, (HID, OUT))
    b2 = jnp.zeros((1, OUT), jnp.float32)

    a_hat = normalized_adjacency(edge_index, N)

    # correctness check against the pure-JAX reference (dropout disabled)
    emb0, out0 = gcn_forward(x, a_hat, w1, b1, w2, b2, kdrop, 0.0)
    emb_ref, out_ref = gcn_reference(x, a_hat, w1, b1, w2, b2)
    jax.block_until_ready((emb0, out0))
    assert bool(jnp.allclose(emb0, emb_ref, atol=2e-2, rtol=2e-2))
    assert bool(jnp.allclose(out0, out_ref, atol=2e-2, rtol=2e-2))

    # forward with dropout (training-mode semantics of F.dropout)
    emb, logits = gcn_forward(x, a_hat, w1, b1, w2, b2, kdrop, DROPOUT)
    jax.block_until_ready((emb, logits))

    assert emb.shape == (N, HID) and logits.shape == (N, OUT)
    assert bool(jnp.all(jnp.isfinite(emb))) and bool(jnp.all(jnp.isfinite(logits)))
    print("KERNEL_OK")
</pallas_src>

<mosaic_0001>
module attributes {stable_mosaic.version = 11 : i64} {
  func.func @feat_transform_kernel(%arg0: i32, %arg1: memref<512x128xbf16, #tpu.memory_space<vmem>>, %arg2: memref<128x128xbf16, #tpu.memory_space<vmem>>, %arg3: memref<512x128xbf16, #tpu.memory_space<vmem>>) attributes {dimension_semantics = [#tpu.dimension_semantics<parallel>], iteration_bounds = array<i64: 1>, scalar_prefetch = 0 : i64, scratch_operands = 0 : i64, tpu.core_type = #tpu.core_type<tc>, window_params = [{transform_indices = @transform_0, window_bounds = array<i64: 512, 128>}, {pipeline_mode = #tpu.pipeline_mode<synchronous>, transform_indices = @transform_1, window_bounds = array<i64: 128, 128>}, {transform_indices = @transform_2, window_bounds = array<i64: 512, 128>}]} {
    %c0 = arith.constant 0 : index
    %c0_0 = arith.constant 0 : index
    %0 = vector.load %arg1[%c0, %c0_0] : memref<512x128xbf16, #tpu.memory_space<vmem>>, vector<512x128xbf16>
    %c0_1 = arith.constant 0 : index
    %c0_2 = arith.constant 0 : index
    %1 = vector.load %arg2[%c0_1, %c0_2] : memref<128x128xbf16, #tpu.memory_space<vmem>>, vector<128x128xbf16>
    %cst = arith.constant dense<0.000000e+00> : vector<512x128xf32>
    %2 = tpu.matmul %0, %1, %cst {dimension_numbers = #tpu.dot_dimension_numbers<[1], [0], [0], [1], [0, 0, 1, 1], [], []>} : vector<512x128xbf16>, vector<128x128xbf16>, vector<512x128xf32> -> vector<512x128xf32>
    %3 = arith.truncf %2 : vector<512x128xf32> to vector<512x128xbf16>
    %c0_3 = arith.constant 0 : index
    %c0_4 = arith.constant 0 : index
    %4 = vector.load %arg3[%c0_3, %c0_4] : memref<512x128xbf16, #tpu.memory_space<vmem>>, vector<512x128xbf16>
    tpu.vector_store %arg3[%c0_3, %c0_4], %3 {strides = array<i32>} : memref<512x128xbf16, #tpu.memory_space<vmem>>, vector<512x128xbf16>,
    return
  }
  func.func @transform_0(%arg0: i32) -> (i32, i32) {
    %c0_i32 = arith.constant 0 : i32
    %c0_i32_0 = arith.constant 0 : i32
    return %arg0, %c0_i32 : i32, i32
  }
  func.func @transform_1(%arg0: i32) -> (i32, i32) {
    %c0_i32 = arith.constant 0 : i32
    %c0_i32_0 = arith.constant 0 : i32
    %c0_i32_1 = arith.constant 0 : i32
    return %c0_i32, %c0_i32_0 : i32, i32
  }
  func.func @transform_2(%arg0: i32) -> (i32, i32) {
    %c0_i32 = arith.constant 0 : i32
    %c0_i32_0 = arith.constant 0 : i32
    return %arg0, %c0_i32 : i32, i32
  }
}

</mosaic_0001>

<bundles_post_ra>
// kernel: tpu_custom_call.1
= control target key start
LH: loop header
LB: loop body
LE: loop exit
PB: predicated region body
PF: predicated region fallthrough
CT: control target
= control target key end

     0   :  { %7 = vsyncpa [#allocation3], 0  ;;  %s1665_s0 = inlined_call_operand.hbm [shape: bf16[512,128], index: 0, kind: input, shape index: {}]   ;;  %s1666_s1 = inlined_call_operand.hbm [shape: bf16[128,128], index: 1, kind: input, shape index: {}]   ;;  %s1667_s2 = inlined_call_operand.hbm [shape: bf16[512,128], index: 2, kind: output, shape index: {}]  }
   0x1   :  { %8 = vsyncpa [#allocation6], 0 }
   0x2   :  { %9 = vsyncpa [#allocation4], 0  ;;  %s1600_s9 = smov [#allocation2]   ;;  %s1528_s13 = scalar_lea.hbm %s1665_s0, 4096 }
   0x3   :  { %s15_s10 = sshll.u32 %s1600_s9, 4  ;;  %p1529_p0 = scmp.ne.s32.totalorder %s1665_s0, %s1528_s13  ;;  %s16_s10 = int_to_ptr.vmem [resolvable:$true] %s15_s10 }
   0x4   :  { %p1532_p1 = scmp.lt.u32.totalorder %s1528_s13, %s1665_s0 }
   0x6   :  { %p1534_p2 = pnand %p1532_p1, %p1529_p0 }
   0x8   :  { %1537 = shalt.err (!%p1534_p2)
}
   0x9   :  { %s1538_s18 = scalar_lea.vmem %s16_s10, 4096  ;;  %p1543_p4 = scmp.lt.s32.totalorder %s16_s10, %s16_s10 }
   0xa   :  { %p1539_p3 = scmp.ne.s32.totalorder %s16_s10, %s1538_s18  ;;  %p1544_p5 = scmp.lt.s32.totalorder %s1538_s18, %s1538_s18 }
   0xc   :  { %p1545_p6 = por %p1544_p5, %p1543_p4 }
   0xe   :  { %p1546_p7 = pnand %p1545_p6, %p1539_p3 }
  0x10   :  { %1549 = shalt.err (!%p1546_p7)
}
  0x11   :  { %s1601_s19 = smov 64   ;;  %s1602_s20 = smov 4  }
  0x12   :  { %21 = dma.hbm_to_vmem [thread:$0]  %s1665_s0, 4096, %s16_s10, [#allocation3], %s1601_s19, %s1601_s19, %s1602_s20  }
  0x13   :  { %s1603_s23 = smov [#allocation5]   ;;  %s1550_s27 = scalar_lea.hbm %s1666_s1, 1024 }
  0x14   :  { %s27_s24 = sshll.u32 %s1603_s23, 4  ;;  %p1551_p8 = scmp.ne.s32.totalorder %s1666_s1, %s1550_s27  ;;  %s28_s24 = int_to_ptr.vmem [resolvable:$true] %s27_s24 }
  0x15   :  { %p1554_p9 = scmp.lt.u32.totalorder %s1550_s27, %s1666_s1 }
  0x17   :  { %p1556_p10 = pnand %p1554_p9, %p1551_p8 }
  0x19   :  { %1559 = shalt.err (!%p1556_p10)
}
  0x1a   :  { %s1560_s4 = scalar_lea.vmem %s28_s24, 1024  ;;  %p1565_p12 = scmp.lt.s32.totalorder %s28_s24, %s28_s24 }
  0x1b   :  { %p1561_p11 = scmp.ne.s32.totalorder %s28_s24, %s1560_s4  ;;  %p1566_p13 = scmp.lt.s32.totalorder %s1560_s4, %s1560_s4 }
  0x1d   :  { %p1567_p0 = por %p1566_p13, %p1565_p12 }
  0x1f   :  { %p1568_p1 = pnand %p1567_p0, %p1561_p11 }
  0x21   :  { %1571 = shalt.err (!%p1568_p1)
}
  0x22   :  { %33 = dma.hbm_to_vmem [thread:$0]  %s1666_s1, 1024, %s28_s24, [#allocation6], %s1601_s19, %s1601_s19, %s1602_s20  }
  0x23   :  { %1594 = dma.done.wait [#allocation3], 4096  }
  0x24   :  { %1595 = vsyncadd [#allocation3], 4294963200 }
  0x25   :  { %1596 = dma.done.wait [#allocation6], 1024  }
  0x26   :  { %1597 = vsyncadd [#allocation6], 4294966272  ;;  %v1488_v0 = vld [vmem:[#allocation5] sm:$0xff]   ;;  %v1489_v1 = vld [vmem:[#allocation5 + $0x8] sm:$0xff]   ;;  %s1604_s1 = smov [#allocation7]  }
  0x27   :  { %1387 = vmatprep.subr.bf16.mxu0 %v1488_v0  ;;  %1467 = vmatprep.subr.bf16.mxu1 %v1488_v0  ;;  %v1490_v2 = vld [vmem:[#allocation5 + $0x10] sm:$0xff]   ;;  %v1491_v3 = vld [vmem:[#allocation5 + $0x18] sm:$0xff]   ;;  %v1496_v4 = vld [vmem:[#allocation2] sm:$0xff]   ;;  %s975_s6 = sshll.u32 %s1604_s1, 4  ;;  %s976_s6 = int_to_ptr.vmem [resolvable:$true] %s975_s6 }
  0x28   :  { %1388 = vmatpush3.bf16.msra.mxu0 %v1488_v0  ;;  %1475 = vmatpush3.bf16.msra.mxu1 %v1488_v0  ;;  %v1497_v5 = vld [vmem:[#allocation2 + $0x80] sm:$0xff]   ;;  %v1493_v7 = vld [vmem:[#allocation5 + $0x28] sm:$0xff]   ;;  %v1494_v8 = vld [vmem:[#allocation5 + $0x30] sm:$0xff]   ;;  %s1572_s7 = scalar_lea.vmem %s976_s6, 4096  ;;  %p1577_p3 = scmp.lt.s32.totalorder %s976_s6, %s976_s6 }
  0x29   :  { %1389 = vmatprep.subr.bf16.mxu0 %v1489_v1  ;;  %1468 = vmatprep.subr.bf16.mxu1 %v1489_v1  ;;  %v1492_v6 = vld [vmem:[#allocation5 + $0x20] sm:$0xff]   ;;  %v1495_v9 = vld [vmem:[#allocation5 + $0x38] sm:$0xff]   ;;  %v1498_v10 = vld [vmem:[#allocation2 + $0x8] sm:$0xff]   ;;  %p1573_p2 = scmp.ne.s32.totalorder %s976_s6, %s1572_s7  ;;  %p1578_p4 = scmp.lt.s32.totalorder %s1572_s7, %s1572_s7 }
  0x2a   :  { %1403 = vmatprep.mubr.bf16.mxu0 %v1496_v4  ;;  %1435 = vmatprep.mubr.bf16.mxu1 %v1497_v5  ;;  %v1499_v11 = vld [vmem:[#allocation2 + $0x88] sm:$0xff]   ;;  %v1500_v12 = vld [vmem:[#allocation2 + $0x10] sm:$0xff]   ;;  %v1502_v14 = vld [vmem:[#allocation2 + $0x18] sm:$0xff]  }
  0x2b   :  { %v1501_v13 = vld [vmem:[#allocation2 + $0x90] sm:$0xff]   ;;  %v1503_v15 = vld [vmem:[#allocation2 + $0x98] sm:$0xff]   ;;  %v1504_v16 = vld [vmem:[#allocation2 + $0x20] sm:$0xff]   ;;  %p1579_p5 = por %p1578_p4, %p1577_p3 }
  0x2c   :  { %1390 = vmatpush3.bf16.msra.mxu0 %v1489_v1  ;;  %1476 = vmatpush3.bf16.msra.mxu1 %v1489_v1  ;;  %v1505_v17 = vld [vmem:[#allocation2 + $0xa0] sm:$0xff]   ;;  %v1506_v18 = vld [vmem:[#allocation2 + $0x28] sm:$0xff]   ;;  %v1508_v20 = vld [vmem:[#allocation2 + $0x30] sm:$0xff]  }
  0x2d   :  { %1391 = vmatprep.subr.bf16.mxu0 %v1490_v2  ;;  %1469 = vmatprep.subr.bf16.mxu1 %v1490_v2  ;;  %v1507_v19 = vld [vmem:[#allocation2 + $0xa8] sm:$0xff]   ;;  %v1509_v21 = vld [vmem:[#allocation2 + $0xb0] sm:$0xff]   ;;  %v1510_v22 = vld [vmem:[#allocation2 + $0x38] sm:$0xff]   ;;  %p1580_p6 = pnand %p1579_p5, %p1573_p2 }
  0x2e   :  { %v1511_v23 = vld [vmem:[#allocation2 + $0xb8] sm:$0xff]   ;;  %v1512_v24 = vld [vmem:[#allocation2 + $0x40] sm:$0xff]   ;;  %v1514_v26 = vld [vmem:[#allocation2 + $0x48] sm:$0xff]  }
  0x2f   :  { %v1513_v25 = vld [vmem:[#allocation2 + $0xc0] sm:$0xff]   ;;  %v1515_v27 = vld [vmem:[#allocation2 + $0xc8] sm:$0xff]   ;;  %v1516_v28 = vld [vmem:[#allocation2 + $0x50] sm:$0xff]  }
  0x30   :  { %1392 = vmatpush3.bf16.msra.mxu0 %v1490_v2  ;;  %1477 = vmatpush3.bf16.msra.mxu1 %v1490_v2  ;;  %v1517_v29 = vld [vmem:[#allocation2 + $0xd0] sm:$0xff]   ;;  %v1518_v30 = vld [vmem:[#allocation2 + $0x58] sm:$0xff]   ;;  %v1520_v32 = vld [vmem:[#allocation2 + $0x60] sm:$0xff]  }
  0x31   :  { %1393 = vmatprep.subr.bf16.mxu0 %v1491_v3  ;;  %1470 = vmatprep.subr.bf16.mxu1 %v1491_v3  ;;  %v1519_v31 = vld [vmem:[#allocation2 + $0xd8] sm:$0xff]   ;;  %v1521_v33 = vld [vmem:[#allocation2 + $0xe0] sm:$0xff]   ;;  %v1522_v34 = vld [vmem:[#allocation2 + $0x68] sm:$0xff]  }
  0x32   :  { %v1523_v35 = vld [vmem:[#allocation2 + $0xe8] sm:$0xff]   ;;  %v1524_v36 = vld [vmem:[#allocation2 + $0x70] sm:$0xff]   ;;  %v1526_v38 = vld [vmem:[#allocation2 + $0x78] sm:$0xff]  }
  0x33   :  { %v1525_v37 = vld [vmem:[#allocation2 + $0xf0] sm:$0xff]   ;;  %v1527_v39 = vld [vmem:[#allocation2 + $0xf8] sm:$0xff]  }
  0x34   :  { %1394 = vmatpush3.bf16.msra.mxu0 %v1491_v3  ;;  %1478 = vmatpush3.bf16.msra.mxu1 %v1491_v3 }
  0x35   :  { %1395 = vmatprep.subr.bf16.mxu0 %v1492_v6  ;;  %1471 = vmatprep.subr.bf16.mxu1 %v1492_v6 }
  0x38   :  { %1396 = vmatpush3.bf16.msra.mxu0 %v1492_v6  ;;  %1479 = vmatpush3.bf16.msra.mxu1 %v1492_v6 }
  0x39   :  { %1397 = vmatprep.subr.bf16.mxu0 %v1493_v7  ;;  %1472 = vmatprep.subr.bf16.mxu1 %v1493_v7 }
  0x3c   :  { %1398 = vmatpush3.bf16.msra.mxu0 %v1493_v7  ;;  %1480 = vmatpush3.bf16.msra.mxu1 %v1493_v7 }
  0x3d   :  { %1399 = vmatprep.subr.bf16.mxu0 %v1494_v8  ;;  %1473 = vmatprep.subr.bf16.mxu1 %v1494_v8 }
  0x40   :  { %1400 = vmatpush3.bf16.msra.mxu0 %v1494_v8  ;;  %1481 = vmatpush3.bf16.msra.mxu1 %v1494_v8 }
  0x41   :  { %1401 = vmatprep.subr.bf16.mxu0 %v1495_v9  ;;  %1474 = vmatprep.subr.bf16.mxu1 %v1495_v9 }
  0x44   :  { %1402 = vmatpush3.bf16.msra.mxu0 %v1495_v9  ;;  %1482 = vmatpush3.bf16.msra.mxu1 %v1495_v9 }
  0x47   :  { %1404 = vmatmul.mubr.bf16.vlgmr.msra.gmra.mrb[0].mxu0 %v1498_v10  ;;  %1436 = vmatmul.mubr.bf16.vlgmr.msra.gmra.mrb[0].mxu1 %v1499_v11 }
  0x48   :  { %1407 = vmatprep.mubr.bf16.mxu0 %v1500_v12  ;;  %1439 = vmatprep.mubr.bf16.mxu1 %v1501_v13 }
  0x4f   :  { %1408 = vmatmul.mubr.bf16.gmra.mrb[4].mxu0 %v1502_v14  ;;  %1440 = vmatmul.mubr.bf16.gmra.mrb[4].mxu1 %v1503_v15 }
  0x50   :  { %1411 = vmatprep.mubr.bf16.mxu0 %v1504_v16  ;;  %1443 = vmatprep.mubr.bf16.mxu1 %v1505_v17 }
  0x57   :  { %1412 = vmatmul.mubr.bf16.gmra.mrb[8].mxu0 %v1506_v18  ;;  %1444 = vmatmul.mubr.bf16.gmra.mrb[8].mxu1 %v1507_v19 }
  0x58   :  { %1415 = vmatprep.mubr.bf16.mxu0 %v1508_v20  ;;  %1447 = vmatprep.mubr.bf16.mxu1 %v1509_v21 }
  0x5f   :  { %1416 = vmatmul.mubr.bf16.gmra.mrb[12].mxu0 %v1510_v22  ;;  %1448 = vmatmul.mubr.bf16.gmra.mrb[12].mxu1 %v1511_v23 }
  0x60   :  { %1419 = vmatprep.mubr.bf16.mxu0 %v1512_v24  ;;  %1451 = vmatprep.mubr.bf16.mxu1 %v1513_v25 }
  0x67   :  { %1420 = vmatmul.mubr.bf16.gmra.mrb[16].mxu0 %v1514_v26  ;;  %1452 = vmatmul.mubr.bf16.gmra.mrb[16].mxu1 %v1515_v27 }
  0x68   :  { %1423 = vmatprep.mubr.bf16.mxu0 %v1516_v28  ;;  %1455 = vmatprep.mubr.bf16.mxu1 %v1517_v29 }
  0x6f   :  { %1424 = vmatmul.mubr.bf16.gmra.mrb[20].mxu0 %v1518_v30  ;;  %1456 = vmatmul.mubr.bf16.gmra.mrb[20].mxu1 %v1519_v31 }
  0x70   :  { %1427 = vmatprep.mubr.bf16.mxu0 %v1520_v32  ;;  %1459 = vmatprep.mubr.bf16.mxu1 %v1521_v33 }
  0x77   :  { %1428 = vmatmul.mubr.bf16.gmra.mrb[24].mxu0 %v1522_v34  ;;  %1460 = vmatmul.mubr.bf16.gmra.mrb[24].mxu1 %v1523_v35 }
  0x78   :  { %1431 = vmatprep.mubr.bf16.mxu0 %v1524_v36  ;;  %1463 = vmatprep.mubr.bf16.mxu1 %v1525_v37 }
  0x7f   :  { %1432 = vmatmul.mubr.bf16.gmra.mrb[28].mxu0 %v1526_v38  ;;  %1464 = vmatmul.mubr.bf16.gmra.mrb[28].mxu1 %v1527_v39 }
 0x11a   :  { %v1405_v40 = vpop.f32.mrb[0].mxu0  ;;  %v1437_v41 = vpop.f32.mrb[0].mxu1 }
 0x11b   :  { %v395_v42 = vpop.f32.mrb[1].mxu0  ;;  %v523_v43 = vpop.f32.mrb[1].mxu1 }
 0x11c   :  { %v1406_v44 = vpop.f32.mrb[2].mxu0  ;;  %v1438_v45 = vpop.f32.mrb[2].mxu1 }
 0x11d   :  { %v1164_v46 = vpack.c.bf16 %v1406_v44, %v1405_v40  ;;  %v1244_v47 = vpack.c.bf16 %v1438_v45, %v1437_v41  ;;  %v398_v48 = vpop.f32.mrb[3].mxu0  ;;  %v526_v49 = vpop.f32.mrb[3].mxu1 }
 0x11e   :  { %v1159_v50 = vpack.c.bf16 %v398_v48, %v395_v42  ;;  %v1239_v51 = vpack.c.bf16 %v526_v49, %v523_v43 }
 0x11f   :  { %1316 = vst [vmem:[#allocation7 + $0x8] sm:$0xff] %v1164_v46   ;;  %1332 = vst [vmem:[#allocation7 + $0x88] sm:$0xff] %v1244_v47  }
 0x120   :  { %1160 = vst [vmem:[#allocation7] sm:$0xff] %v1159_v50   ;;  %1331 = vst [vmem:[#allocation7 + $0x80] sm:$0xff] %v1239_v51  }
 0x122   :  { %v1409_v52 = vpop.f32.mrb[4].mxu0  ;;  %v1441_v53 = vpop.f32.mrb[4].mxu1 }
 0x123   :  { %v411_v54 = vpop.f32.mrb[5].mxu0  ;;  %v539_v55 = vpop.f32.mrb[5].mxu1 }
 0x124   :  { %v1410_v56 = vpop.f32.mrb[6].mxu0  ;;  %v1442_v57 = vpop.f32.mrb[6].mxu1 }
 0x125   :  { %v1174_v58 = vpack.c.bf16 %v1410_v56, %v1409_v52  ;;  %v1254_v59 = vpack.c.bf16 %v1442_v57, %v1441_v53  ;;  %v414_v60 = vpop.f32.mrb[7].mxu0  ;;  %v542_v61 = vpop.f32.mrb[7].mxu1 }
 0x126   :  { %v1169_v62 = vpack.c.bf16 %v414_v60, %v411_v54  ;;  %v1249_v63 = vpack.c.bf16 %v542_v61, %v539_v55 }
 0x127   :  { %1318 = vst [vmem:[#allocation7 + $0x18] sm:$0xff] %v1174_v58   ;;  %1334 = vst [vmem:[#allocation7 + $0x98] sm:$0xff] %v1254_v59  }
 0x128   :  { %1317 = vst [vmem:[#allocation7 + $0x10] sm:$0xff] %v1169_v62   ;;  %1333 = vst [vmem:[#allocation7 + $0x90] sm:$0xff] %v1249_v63  }
 0x12a   :  { %v1413_v0 = vpop.f32.mrb[8].mxu0  ;;  %v1445_v1 = vpop.f32.mrb[8].mxu1 }
 0x12b   :  { %v427_v2 = vpop.f32.mrb[9].mxu0  ;;  %v555_v3 = vpop.f32.mrb[9].mxu1 }
 0x12c   :  { %v1414_v4 = vpop.f32.mrb[10].mxu0  ;;  %v1446_v5 = vpop.f32.mrb[10].mxu1 }
 0x12d   :  { %v1184_v6 = vpack.c.bf16 %v1414_v4, %v1413_v0  ;;  %v1264_v7 = vpack.c.bf16 %v1446_v5, %v1445_v1  ;;  %v430_v8 = vpop.f32.mrb[11].mxu0  ;;  %v558_v9 = vpop.f32.mrb[11].mxu1 }
 0x12e   :  { %v1179_v10 = vpack.c.bf16 %v430_v8, %v427_v2  ;;  %v1259_v11 = vpack.c.bf16 %v558_v9, %v555_v3 }
 0x12f   :  { %1320 = vst [vmem:[#allocation7 + $0x28] sm:$0xff] %v1184_v6   ;;  %1336 = vst [vmem:[#allocation7 + $0xa8] sm:$0xff] %v1264_v7  }
 0x130   :  { %1319 = vst [vmem:[#allocation7 + $0x20] sm:$0xff] %v1179_v10   ;;  %1335 = vst [vmem:[#allocation7 + $0xa0] sm:$0xff] %v1259_v11  }
 0x132   :  { %v1417_v12 = vpop.f32.mrb[12].mxu0  ;;  %v1449_v13 = vpop.f32.mrb[12].mxu1 }
 0x133   :  { %v443_v14 = vpop.f32.mrb[13].mxu0  ;;  %v571_v15 = vpop.f32.mrb[13].mxu1 }
 0x134   :  { %v1418_v16 = vpop.f32.mrb[14].mxu0  ;;  %v1450_v17 = vpop.f32.mrb[14].mxu1 }
 0x135   :  { %v1194_v18 = vpack.c.bf16 %v1418_v16, %v1417_v12  ;;  %v1274_v19 = vpack.c.bf16 %v1450_v17, %v1449_v13  ;;  %v446_v20 = vpop.f32.mrb[15].mxu0  ;;  %v574_v21 = vpop.f32.mrb[15].mxu1 }
 0x136   :  { %v1189_v22 = vpack.c.bf16 %v446_v20, %v443_v14  ;;  %v1269_v23 = vpack.c.bf16 %v574_v21, %v571_v15 }
 0x137   :  { %1322 = vst [vmem:[#allocation7 + $0x38] sm:$0xff] %v1194_v18   ;;  %1338 = vst [vmem:[#allocation7 + $0xb8] sm:$0xff] %v1274_v19  }
 0x138   :  { %1321 = vst [vmem:[#allocation7 + $0x30] sm:$0xff] %v1189_v22   ;;  %1337 = vst [vmem:[#allocation7 + $0xb0] sm:$0xff] %v1269_v23  }
 0x13a   :  { %v1421_v24 = vpop.f32.mrb[16].mxu0  ;;  %v1453_v25 = vpop.f32.mrb[16].mxu1 }
 0x13b   :  { %v459_v26 = vpop.f32.mrb[17].mxu0  ;;  %v587_v27 = vpop.f32.mrb[17].mxu1 }
 0x13c   :  { %v1422_v28 = vpop.f32.mrb[18].mxu0  ;;  %v1454_v29 = vpop.f32.mrb[18].mxu1 }
 0x13d   :  { %v1204_v30 = vpack.c.bf16 %v1422_v28, %v1421_v24  ;;  %v1284_v31 = vpack.c.bf16 %v1454_v29, %v1453_v25  ;;  %v462_v32 = vpop.f32.mrb[19].mxu0  ;;  %v590_v33 = vpop.f32.mrb[19].mxu1 }
 0x13e   :  { %v1199_v34 = vpack.c.bf16 %v462_v32, %v459_v26  ;;  %v1279_v35 = vpack.c.bf16 %v590_v33, %v587_v27 }
 0x13f   :  { %1324 = vst [vmem:[#allocation7 + $0x48] sm:$0xff] %v1204_v30   ;;  %1340 = vst [vmem:[#allocation7 + $0xc8] sm:$0xff] %v1284_v31  }
 0x140   :  { %1323 = vst [vmem:[#allocation7 + $0x40] sm:$0xff] %v1199_v34   ;;  %1339 = vst [vmem:[#allocation7 + $0xc0] sm:$0xff] %v1279_v35  }
 0x142   :  { %v1425_v36 = vpop.f32.mrb[20].mxu0  ;;  %v1457_v37 = vpop.f32.mrb[20].mxu1 }
 0x143   :  { %v475_v38 = vpop.f32.mrb[21].mxu0  ;;  %v603_v39 = vpop.f32.mrb[21].mxu1 }
 0x144   :  { %v1426_v40 = vpop.f32.mrb[22].mxu0  ;;  %v1458_v41 = vpop.f32.mrb[22].mxu1 }
 0x145   :  { %v1214_v42 = vpack.c.bf16 %v1426_v40, %v1425_v36  ;;  %v1294_v43 = vpack.c.bf16 %v1458_v41, %v1457_v37  ;;  %v478_v44 = vpop.f32.mrb[23].mxu0  ;;  %v606_v45 = vpop.f32.mrb[23].mxu1 }
 0x146   :  { %v1209_v46 = vpack.c.bf16 %v478_v44, %v475_v38  ;;  %v1289_v47 = vpack.c.bf16 %v606_v45, %v603_v39 }
 0x147   :  { %1326 = vst [vmem:[#allocation7 + $0x58] sm:$0xff] %v1214_v42   ;;  %1342 = vst [vmem:[#allocation7 + $0xd8] sm:$0xff] %v1294_v43  }
 0x148   :  { %1325 = vst [vmem:[#allocation7 + $0x50] sm:$0xff] %v1209_v46   ;;  %1341 = vst [vmem:[#allocation7 + $0xd0] sm:$0xff] %v1289_v47  }
 0x14a   :  { %v1429_v48 = vpop.f32.mrb[24].mxu0  ;;  %v1461_v49 = vpop.f32.mrb[24].mxu1 }
 0x14b   :  { %v491_v50 = vpop.f32.mrb[25].mxu0  ;;  %v619_v51 = vpop.f32.mrb[25].mxu1 }
 0x14c   :  { %v1430_v52 = vpop.f32.mrb[26].mxu0  ;;  %v1462_v53 = vpop.f32.mrb[26].mxu1 }
 0x14d   :  { %v1224_v54 = vpack.c.bf16 %v1430_v52, %v1429_v48  ;;  %v1304_v55 = vpack.c.bf16 %v1462_v53, %v1461_v49  ;;  %v494_v56 = vpop.f32.mrb[27].mxu0  ;;  %v622_v57 = vpop.f32.mrb[27].mxu1 }
 0x14e   :  { %v1219_v58 = vpack.c.bf16 %v494_v56, %v491_v50  ;;  %v1299_v59 = vpack.c.bf16 %v622_v57, %v619_v51 }
 0x14f   :  { %1328 = vst [vmem:[#allocation7 + $0x68] sm:$0xff] %v1224_v54   ;;  %1344 = vst [vmem:[#allocation7 + $0xe8] sm:$0xff] %v1304_v55  }
 0x150   :  { %1327 = vst [vmem:[#allocation7 + $0x60] sm:$0xff] %v1219_v58   ;;  %1343 = vst [vmem:[#allocation7 + $0xe0] sm:$0xff] %v1299_v59  }
 0x152   :  { %v1433_v60 = vpop.f32.mrb[28].mxu0  ;;  %v1465_v61 = vpop.f32.mrb[28].mxu1 }
 0x153   :  { %v507_v62 = vpop.f32.mrb[29].mxu0  ;;  %v635_v63 = vpop.f32.mrb[29].mxu1 }
 0x154   :  { %v1434_v0 = vpop.f32.mrb[30].mxu0  ;;  %v1466_v1 = vpop.f32.mrb[30].mxu1 }
 0x155   :  { %v1234_v2 = vpack.c.bf16 %v1434_v0, %v1433_v60  ;;  %v1314_v3 = vpack.c.bf16 %v1466_v1, %v1465_v61  ;;  %v510_v4 = vpop.f32.mrb[31].mxu0  ;;  %v638_v5 = vpop.f32.mrb[31].mxu1 }
 0x156   :  { %v1229_v6 = vpack.c.bf16 %v510_v4, %v507_v62  ;;  %v1309_v7 = vpack.c.bf16 %v638_v5, %v635_v63 }
 0x157   :  { %1330 = vst [vmem:[#allocation7 + $0x78] sm:$0xff] %v1234_v2   ;;  %1346 = vst [vmem:[#allocation7 + $0xf8] sm:$0xff] %v1314_v3  }
 0x158   :  { %1329 = vst [vmem:[#allocation7 + $0x70] sm:$0xff] %v1229_v6   ;;  %1345 = vst [vmem:[#allocation7 + $0xf0] sm:$0xff] %v1309_v7  }
 0x159   :  { %1583 = shalt.err (!%p1580_p6)
}
 0x15a   :  { %s1584_s10 = scalar_lea.hbm %s1667_s2, 4096 }
 0x15b   :  { %p1585_p7 = scmp.ne.s32.totalorder %s1667_s2, %s1584_s10  ;;  %p1588_p8 = scmp.lt.u32.totalorder %s1584_s10, %s1667_s2 }
 0x15d   :  { %p1590_p9 = pnand %p1588_p8, %p1585_p7 }
 0x15f   :  { %1593 = shalt.err (!%p1590_p9)
}
 0x160   :  { %981 = dma.vmem_to_hbm [thread:$0]  %s976_s6, 4096, %s1667_s2, [#allocation4], %s1601_s19, %s1601_s19, %s1602_s20  }
 0x161   :  { %1598 = dma.done.wait [#allocation4], 4096  }
 0x162   :  { %1599 = vsyncadd [#allocation4], 4294963200 }
 0x163   :  { %985 = vsyncpa [#allocation3], 1 }
 0x164   :  { %986 = vsyncpa [#allocation6], 1 }
 0x165   :  { %987 = vsyncpa [#allocation4], 1 }

</bundles_post_ra>
